<compile_context>
chip_gen: v6e
topology: v6e:2x2x1
jax: 0.10.0
libtpu: 0.0.40
codegen_flags: <defaults>
</compile_context>

<pallas_src>
import functools
import math

import jax
import jax.numpy as jnp
from jax.experimental import pallas as pl
from jax.experimental.pallas import tpu as pltpu


def _highdiv_kernel(x_ref, w1t_ref, w2t_ref, o_ref, *, order, ci):
    """One channels-first pixel tile.

    x_ref   : (C, TM)             channels on sublanes, pixels on lanes
    w1t_ref : (num_pairs*Ci, C)   all first-layer 1x1 convs, transposed & stacked
    w2t_ref : (order, C, Ci)      second-layer 1x1 convs, transposed
    o_ref   : (C, TM)
    """
    x = x_ref[...]                                            # native dtype

    # All first-layer 1x1 convs fused into a single MXU matmul:
    #   (num_pairs*Ci, C) @ (C, TM) -> (num_pairs*Ci, TM), f32 accumulate.
    y_all = jnp.dot(w1t_ref[...], x, preferred_element_type=jnp.float32)

    inv_order = 1.0 / float(order)
    y_sum = jnp.zeros(x.shape, jnp.float32)
    cnt = 0
    for j in range(order):                    # order is static -> unrolled
        # cumulative elementwise product of branch j's (j+1) projections;
        # slices are static and 8-sublane aligned (ci is a multiple of 8).
        y_temp = y_all[cnt * ci:(cnt + 1) * ci, :]
        cnt += 1
        for _ in range(1, j + 1):
            y_temp = y_temp * y_all[cnt * ci:(cnt + 1) * ci, :]
            cnt += 1
        y_rel = jnp.maximum(y_temp, 0.0)                      # ReLU
        if y_rel.dtype != w2t_ref.dtype:
            y_rel = y_rel.astype(w2t_ref.dtype)
        # second-layer 1x1 conv: (C, Ci) @ (Ci, TM) -> (C, TM)
        z = jnp.dot(w2t_ref[j], y_rel, preferred_element_type=jnp.float32)
        # sigmoid(z) == 0.5*tanh(z/2) + 0.5 : transcendental stays on the EUP
        # slot, no full-precision VPU divide.
        y_sum = y_sum + (0.5 * jnp.tanh(0.5 * z) + 0.5)

    o_ref[...] = (x.astype(jnp.float32) * y_sum * inv_order).astype(o_ref.dtype)


def highdiv_forward(x_nchw, w1, w2, order, *, tm=4096):
    """Apply HighDivModule to an NCHW input.

    x_nchw : (N, C, H, W)
    w1     : (num_pairs, C, C_inter)   stacked order{o}_{j}_{i} 1x1 conv weights
    w2     : (order, C_inter, C)       stacked convb{o}_{i} 1x1 conv weights
    """
    N, C, H, W = x_nchw.shape
    num_pairs, Cw, Ci = w1.shape
    assert Cw == C and w2.shape == (order, Ci, C)
    assert num_pairs == order * (order + 1) // 2

    itemsize = jnp.dtype(x_nchw.dtype).itemsize
    sub_pack = max(8, 32 // itemsize)          # sublane packing (8 f32, 16 bf16)
    assert C % sub_pack == 0, "in_channels must match the sublane packing of x"

    # Pad Ci up to a multiple of 8 (zero pad == exact semantics) so every
    # per-branch slice of the fused f32 first-layer result is sublane-aligned.
    ci_pad = ((Ci + 7) // 8) * 8
    if ci_pad != Ci:
        w1 = jnp.pad(w1, ((0, 0), (0, 0), (0, ci_pad - Ci)))
        w2 = jnp.pad(w2, ((0, 0), (0, ci_pad - Ci), (0, 0)))

    # Pre-transpose / stack weights ONCE (hoisted out of the kernel); weights
    # go on the LEFT of every matmul so pixels stay on the lane axis.
    w1t = jnp.transpose(w1, (0, 2, 1)).reshape(num_pairs * ci_pad, C)  # (P*Ci,C)
    w2t = jnp.transpose(w2, (0, 2, 1))                                 # (o,C,Ci)

    HW = H * W
    # Channels-first slab: NCHW is already (N, C, H*W)-contiguous -> free.
    x2 = x_nchw.reshape(N * C, HW)

    # ---- per-generation VMEM budget -> pixel-tile cap --------------------
    try:
        vmem_cap = int(pltpu.get_tpu_info().vmem_capacity_bytes)
    except Exception:
        vmem_cap = 64 * 1024 * 1024            # conservative (v7x-sized) fallback
    vmem_limit = max(32 * 1024 * 1024,
                     min(vmem_cap * 3 // 4, 96 * 1024 * 1024))

    w_itemsize = jnp.dtype(w1.dtype).itemsize
    weight_bytes = (num_pairs * ci_pad * C + order * C * ci_pad) * w_itemsize
    # per pixel-column: x/out double buffers (native dtype) + f32 intermediates
    bytes_per_col = (2 * 2 * C) * itemsize \
        + (num_pairs * ci_pad + 3 * C + ci_pad) * 4
    budget = vmem_limit - 2 * weight_bytes - (2 << 20)       # slack
    tm_req = max(128, (int(tm) // 128) * 128)
    tm_cap = max(128, min(tm_req, (budget // bytes_per_col) // 128 * 128))

    # ---- balanced tiling of the pixel axis (no wrapper-side pad/slice) ----
    if HW <= 128:
        # full-dim block is allowed even when HW is not a multiple of 128
        tm_eff, n_tiles = HW, 1
    else:
        lanes = pl.cdiv(HW, 128)               # 128-lane chunks
        n_tiles = pl.cdiv(lanes, tm_cap // 128)
        # megacore: keep >= 2 grid steps so the second TC isn't idle (v7x)
        if N * n_tiles < 2 and lanes >= 2:
            n_tiles = 2
        tm_eff = pl.cdiv(lanes, n_tiles) * 128
        # the last block may run past HW; Mosaic masks the edge loads/stores,
        # and per-pixel independence keeps the valid lanes exact.

    grid = (N, n_tiles)
    kernel = functools.partial(_highdiv_kernel, order=order, ci=ci_pad)

    # cost estimate consistent with what the kernel actually touches
    m_cov = N * n_tiles * tm_eff
    cost = pl.CostEstimate(
        flops=2 * m_cov * C * ci_pad * (num_pairs + order),
        transcendentals=order * m_cov * C,
        bytes_accessed=2 * m_cov * C * itemsize + weight_bytes,
    )

    def _call(weight_mode):
        wkw = {} if weight_mode is None else {"pipeline_mode": weight_mode}
        return pl.pallas_call(
            kernel,
            out_shape=jax.ShapeDtypeStruct((N * C, HW), x_nchw.dtype),
            grid_spec=pltpu.PrefetchScalarGridSpec(
                num_scalar_prefetch=0,
                grid=grid,
                in_specs=[
                    pl.BlockSpec((C, tm_eff), lambda n, p: (n, p)),
                    pl.BlockSpec((num_pairs * ci_pad, C),
                                 lambda n, p: (0, 0), **wkw),
                    pl.BlockSpec((order, C, ci_pad),
                                 lambda n, p: (0, 0, 0), **wkw),
                ],
                out_specs=pl.BlockSpec((C, tm_eff), lambda n, p: (n, p)),
            ),
            compiler_params=pltpu.CompilerParams(
                dimension_semantics=("parallel", "parallel"),
                vmem_limit_bytes=int(vmem_limit),
            ),
            cost_estimate=cost,
        )(x2, w1t, w2t)

    try:
        # resident weights: constant index map + single buffer -> VMEM headroom
        out2 = _call(pl.Buffered(1))
    except Exception:
        out2 = _call(None)      # fallback to the default pipeline if rejected

    return out2.reshape(N, C, H, W)


def highdiv_reference(x_nchw, w1, w2, order):
    """Pure-JAX reference mirroring the PyTorch forward exactly."""
    N, C, H, W = x_nchw.shape
    x = jnp.transpose(x_nchw, (0, 2, 3, 1)).reshape(-1, C).astype(jnp.float32)
    cnt = 0
    y_sum = jnp.zeros_like(x)
    for j in range(order):
        y_temp = 1.0
        for _ in range(j + 1):
            y_temp = y_temp * (x @ w1[cnt].astype(jnp.float32))
            cnt += 1
        y_rel = jnp.maximum(y_temp, 0.0)
        y_sum = y_sum + jax.nn.sigmoid(y_rel @ w2[j].astype(jnp.float32))
    out = x * y_sum / order
    return out.reshape(N, H, W, C).transpose(0, 3, 1, 2).astype(x_nchw.dtype)


if __name__ == "__main__":
    # Small deterministic example. in_channels is a multiple of 8; the spatial
    # extent (16x16 = 256 pixels) is lane-aligned so no edge masking occurs.
    order = 2
    N, C, H, W = 2, 32, 16, 16
    C_inter = C // 8 * 2                 # = 8
    num_pairs = order * (order + 1) // 2

    key = jax.random.PRNGKey(0)
    kx, k1, k2 = jax.random.split(key, 3)

    x = jax.random.normal(kx, (N, C, H, W), dtype=jnp.float32)

    # Deterministic 1x1 conv weights (PyTorch (out,in,1,1) -> matmul (in,out)).
    std1 = 1.0 / math.sqrt(C)
    std2 = 1.0 / math.sqrt(C_inter)
    w1 = std1 * jax.random.normal(k1, (num_pairs, C, C_inter), dtype=jnp.float32)
    w2 = std2 * jax.random.normal(k2, (order, C_inter, C), dtype=jnp.float32)

    out = highdiv_forward(x, w1, w2, order)
    out = jax.block_until_ready(out)

    ref = highdiv_reference(x, w1, w2, order)
    assert out.shape == x.shape
    assert jnp.allclose(out, ref, atol=1e-4, rtol=1e-4), "mismatch vs reference"

    print("KERNEL_OK")
</pallas_src>

<mosaic_0001>
module attributes {stable_mosaic.version = 11 : i64} {
  func.func @_highdiv_kernel(%arg0: i32, %arg1: i32, %arg2: memref<32x256xf32, #tpu.memory_space<vmem>>, %arg3: memref<24x32xf32, #tpu.memory_space<vmem>>, %arg4: memref<2x32x8xf32, #tpu.memory_space<vmem>>, %arg5: memref<32x256xf32, #tpu.memory_space<vmem>>) attributes {dimension_semantics = [#tpu.dimension_semantics<parallel>, #tpu.dimension_semantics<parallel>], iteration_bounds = array<i64: 2, 1>, scalar_prefetch = 0 : i64, scratch_operands = 0 : i64, tpu.core_type = #tpu.core_type<tc>, window_params = [{transform_indices = @transform_0, window_bounds = array<i64: 32, 256>}, {pipeline_mode = #tpu.pipeline_mode<synchronous>, transform_indices = @transform_1, window_bounds = array<i64: 24, 32>}, {pipeline_mode = #tpu.pipeline_mode<synchronous>, transform_indices = @transform_2, window_bounds = array<i64: 2, 32, 8>}, {transform_indices = @transform_3, window_bounds = array<i64: 32, 256>}]} {
    %c0 = arith.constant 0 : index
    %c0_0 = arith.constant 0 : index
    %0 = vector.load %arg2[%c0, %c0_0] : memref<32x256xf32, #tpu.memory_space<vmem>>, vector<32x256xf32>
    %c0_1 = arith.constant 0 : index
    %c0_2 = arith.constant 0 : index
    %1 = vector.load %arg3[%c0_1, %c0_2] : memref<24x32xf32, #tpu.memory_space<vmem>>, vector<24x32xf32>
    %cst = arith.constant dense<0.000000e+00> : vector<24x256xf32>
    %2 = tpu.matmul %1, %0, %cst {dimension_numbers = #tpu.dot_dimension_numbers<[1], [0], [0], [1], [0, 0, 1, 1], [], []>} : vector<24x32xf32>, vector<32x256xf32>, vector<24x256xf32> -> vector<24x256xf32>
    %cst_3 = arith.constant 0.000000e+00 : f32
    %3 = vector.broadcast %cst_3 : f32 to vector<32x256xf32>
    %4 = vector.extract_strided_slice %2 {offsets = [0, 0], sizes = [8, 256], strides = [1, 1]} : vector<24x256xf32> to vector<8x256xf32>
    %cst_4 = arith.constant 0.000000e+00 : f32
    %5 = vector.broadcast %cst_4 : f32 to vector<8x256xf32>
    %6 = arith.maximumf %4, %5 : vector<8x256xf32>
    %c0_5 = arith.constant 0 : index
    %c0_6 = arith.constant 0 : index
    %c0_7 = arith.constant 0 : index
    %7 = vector.load %arg4[%c0_5, %c0_6, %c0_7] : memref<2x32x8xf32, #tpu.memory_space<vmem>>, vector<1x32x8xf32>
    %8 = vector.shape_cast %7 : vector<1x32x8xf32> to vector<32x8xf32>
    %cst_8 = arith.constant dense<0.000000e+00> : vector<32x256xf32>
    %9 = tpu.matmul %8, %6, %cst_8 {dimension_numbers = #tpu.dot_dimension_numbers<[1], [0], [0], [1], [0, 0, 1, 1], [], []>} : vector<32x8xf32>, vector<8x256xf32>, vector<32x256xf32> -> vector<32x256xf32>
    %cst_9 = arith.constant 5.000000e-01 : f32
    %10 = vector.broadcast %cst_9 : f32 to vector<32x256xf32>
    %11 = arith.mulf %10, %9 : vector<32x256xf32>
    %12 = math.tanh %11 : vector<32x256xf32>
    %cst_10 = arith.constant 5.000000e-01 : f32
    %13 = vector.broadcast %cst_10 : f32 to vector<32x256xf32>
    %14 = arith.mulf %13, %12 : vector<32x256xf32>
    %cst_11 = arith.constant 5.000000e-01 : f32
    %15 = vector.broadcast %cst_11 : f32 to vector<32x256xf32>
    %16 = arith.addf %14, %15 : vector<32x256xf32>
    %17 = arith.addf %3, %16 : vector<32x256xf32>
    %18 = vector.extract_strided_slice %2 {offsets = [8, 0], sizes = [8, 256], strides = [1, 1]} : vector<24x256xf32> to vector<8x256xf32>
    %19 = vector.extract_strided_slice %2 {offsets = [16, 0], sizes = [8, 256], strides = [1, 1]} : vector<24x256xf32> to vector<8x256xf32>
    %20 = arith.mulf %18, %19 : vector<8x256xf32>
    %cst_12 = arith.constant 0.000000e+00 : f32
    %21 = vector.broadcast %cst_12 : f32 to vector<8x256xf32>
    %22 = arith.maximumf %20, %21 : vector<8x256xf32>
    %c1 = arith.constant 1 : index
    %c0_13 = arith.constant 0 : index
    %c0_14 = arith.constant 0 : index
    %23 = vector.load %arg4[%c1, %c0_13, %c0_14] : memref<2x32x8xf32, #tpu.memory_space<vmem>>, vector<1x32x8xf32>
    %24 = vector.shape_cast %23 : vector<1x32x8xf32> to vector<32x8xf32>
    %cst_15 = arith.constant dense<0.000000e+00> : vector<32x256xf32>
    %25 = tpu.matmul %24, %22, %cst_15 {dimension_numbers = #tpu.dot_dimension_numbers<[1], [0], [0], [1], [0, 0, 1, 1], [], []>} : vector<32x8xf32>, vector<8x256xf32>, vector<32x256xf32> -> vector<32x256xf32>
    %cst_16 = arith.constant 5.000000e-01 : f32
    %26 = vector.broadcast %cst_16 : f32 to vector<32x256xf32>
    %27 = arith.mulf %26, %25 : vector<32x256xf32>
    %28 = math.tanh %27 : vector<32x256xf32>
    %cst_17 = arith.constant 5.000000e-01 : f32
    %29 = vector.broadcast %cst_17 : f32 to vector<32x256xf32>
    %30 = arith.mulf %29, %28 : vector<32x256xf32>
    %cst_18 = arith.constant 5.000000e-01 : f32
    %31 = vector.broadcast %cst_18 : f32 to vector<32x256xf32>
    %32 = arith.addf %30, %31 : vector<32x256xf32>
    %33 = arith.addf %17, %32 : vector<32x256xf32>
    %34 = arith.mulf %0, %33 : vector<32x256xf32>
    %cst_19 = arith.constant 5.000000e-01 : f32
    %35 = vector.broadcast %cst_19 : f32 to vector<32x256xf32>
    %36 = arith.mulf %34, %35 : vector<32x256xf32>
    %c0_20 = arith.constant 0 : index
    %c0_21 = arith.constant 0 : index
    %37 = vector.load %arg5[%c0_20, %c0_21] : memref<32x256xf32, #tpu.memory_space<vmem>>, vector<32x256xf32>
    tpu.vector_store %arg5[%c0_20, %c0_21], %36 {strides = array<i32>} : memref<32x256xf32, #tpu.memory_space<vmem>>, vector<32x256xf32>,
    return
  }
  func.func @transform_0(%arg0: i32, %arg1: i32) -> (i32, i32) {
    %c0_i32 = arith.constant 0 : i32
    return %arg0, %arg1 : i32, i32
  }
  func.func @transform_1(%arg0: i32, %arg1: i32) -> (i32, i32) {
    %c0_i32 = arith.constant 0 : i32
    %c0_i32_0 = arith.constant 0 : i32
    %c0_i32_1 = arith.constant 0 : i32
    return %c0_i32, %c0_i32_0 : i32, i32
  }
  func.func @transform_2(%arg0: i32, %arg1: i32) -> (i32, i32, i32) {
    %c0_i32 = arith.constant 0 : i32
    %c0_i32_0 = arith.constant 0 : i32
    %c0_i32_1 = arith.constant 0 : i32
    %c0_i32_2 = arith.constant 0 : i32
    return %c0_i32, %c0_i32_0, %c0_i32_1 : i32, i32, i32
  }
  func.func @transform_3(%arg0: i32, %arg1: i32) -> (i32, i32) {
    %c0_i32 = arith.constant 0 : i32
    return %arg0, %arg1 : i32, i32
  }
}

module attributes {stable_mosaic.version = 11 : i64} {
  func.func @_highdiv_kernel(%arg0: i32, %arg1: i32, %arg2: memref<32x256xf32, #tpu.memory_space<vmem>>, %arg3: memref<24x32xf32, #tpu.memory_space<vmem>>, %arg4: memref<2x32x8xf32, #tpu.memory_space<vmem>>, %arg5: memref<32x256xf32, #tpu.memory_space<vmem>>) attributes {dimension_semantics = [#tpu.dimension_semantics<parallel>, #tpu.dimension_semantics<parallel>], iteration_bounds = array<i64: 2, 1>, scalar_prefetch = 0 : i64, scratch_operands = 0 : i64, tpu.core_type = #tpu.core_type<tc>, window_params = [{transform_indices = @transform_0, window_bounds = array<i64: 32, 256>}, {pipeline_mode = #tpu.pipeline_mode<synchronous>, transform_indices = @transform_1, window_bounds = array<i64: 24, 32>}, {pipeline_mode = #tpu.pipeline_mode<synchronous>, transform_indices = @transform_2, window_bounds = array<i64: 2, 32, 8>}, {transform_indices = @transform_3, window_bounds = array<i64: 32, 256>}]} {
    %c0 = arith.constant 0 : index
    %c0_0 = arith.constant 0 : index
    %0 = vector.load %arg2[%c0, %c0_0] : memref<32x256xf32, #tpu.memory_space<vmem>>, vector<32x256xf32>
    %c0_1 = arith.constant 0 : index
    %c0_2 = arith.constant 0 : index
    %1 = vector.load %arg3[%c0_1, %c0_2] : memref<24x32xf32, #tpu.memory_space<vmem>>, vector<24x32xf32>
    %cst = arith.constant dense<0.000000e+00> : vector<24x256xf32>
    %2 = tpu.matmul %1, %0, %cst {dimension_numbers = #tpu.dot_dimension_numbers<[1], [0], [0], [1], [0, 0, 1, 1], [], []>} : vector<24x32xf32>, vector<32x256xf32>, vector<24x256xf32> -> vector<24x256xf32>
    %cst_3 = arith.constant 0.000000e+00 : f32
    %3 = vector.broadcast %cst_3 : f32 to vector<32x256xf32>
    %4 = vector.extract_strided_slice %2 {offsets = [0, 0], sizes = [8, 256], strides = [1, 1]} : vector<24x256xf32> to vector<8x256xf32>
    %cst_4 = arith.constant 0.000000e+00 : f32
    %5 = vector.broadcast %cst_4 : f32 to vector<8x256xf32>
    %6 = arith.maximumf %4, %5 : vector<8x256xf32>
    %c0_5 = arith.constant 0 : index
    %c0_6 = arith.constant 0 : index
    %c0_7 = arith.constant 0 : index
    %7 = vector.load %arg4[%c0_5, %c0_6, %c0_7] : memref<2x32x8xf32, #tpu.memory_space<vmem>>, vector<1x32x8xf32>
    %8 = vector.shape_cast %7 : vector<1x32x8xf32> to vector<32x8xf32>
    %cst_8 = arith.constant dense<0.000000e+00> : vector<32x256xf32>
    %9 = tpu.matmul %8, %6, %cst_8 {dimension_numbers = #tpu.dot_dimension_numbers<[1], [0], [0], [1], [0, 0, 1, 1], [], []>} : vector<32x8xf32>, vector<8x256xf32>, vector<32x256xf32> -> vector<32x256xf32>
    %cst_9 = arith.constant 5.000000e-01 : f32
    %10 = vector.broadcast %cst_9 : f32 to vector<32x256xf32>
    %11 = arith.mulf %10, %9 : vector<32x256xf32>
    %12 = math.tanh %11 : vector<32x256xf32>
    %cst_10 = arith.constant 5.000000e-01 : f32
    %13 = vector.broadcast %cst_10 : f32 to vector<32x256xf32>
    %14 = arith.mulf %13, %12 : vector<32x256xf32>
    %cst_11 = arith.constant 5.000000e-01 : f32
    %15 = vector.broadcast %cst_11 : f32 to vector<32x256xf32>
    %16 = arith.addf %14, %15 : vector<32x256xf32>
    %17 = arith.addf %3, %16 : vector<32x256xf32>
    %18 = vector.extract_strided_slice %2 {offsets = [8, 0], sizes = [8, 256], strides = [1, 1]} : vector<24x256xf32> to vector<8x256xf32>
    %19 = vector.extract_strided_slice %2 {offsets = [16, 0], sizes = [8, 256], strides = [1, 1]} : vector<24x256xf32> to vector<8x256xf32>
    %20 = arith.mulf %18, %19 : vector<8x256xf32>
    %cst_12 = arith.constant 0.000000e+00 : f32
    %21 = vector.broadcast %cst_12 : f32 to vector<8x256xf32>
    %22 = arith.maximumf %20, %21 : vector<8x256xf32>
    %c1 = arith.constant 1 : index
    %c0_13 = arith.constant 0 : index
    %c0_14 = arith.constant 0 : index
    %23 = vector.load %arg4[%c1, %c0_13, %c0_14] : memref<2x32x8xf32, #tpu.memory_space<vmem>>, vector<1x32x8xf32>
    %24 = vector.shape_cast %23 : vector<1x32x8xf32> to vector<32x8xf32>
    %cst_15 = arith.constant dense<0.000000e+00> : vector<32x256xf32>
    %25 = tpu.matmul %24, %22, %cst_15 {dimension_numbers = #tpu.dot_dimension_numbers<[1], [0], [0], [1], [0, 0, 1, 1], [], []>} : vector<32x8xf32>, vector<8x256xf32>, vector<32x256xf32> -> vector<32x256xf32>
    %cst_16 = arith.constant 5.000000e-01 : f32
    %26 = vector.broadcast %cst_16 : f32 to vector<32x256xf32>
    %27 = arith.mulf %26, %25 : vector<32x256xf32>
    %28 = math.tanh %27 : vector<32x256xf32>
    %cst_17 = arith.constant 5.000000e-01 : f32
    %29 = vector.broadcast %cst_17 : f32 to vector<32x256xf32>
    %30 = arith.mulf %29, %28 : vector<32x256xf32>
    %cst_18 = arith.constant 5.000000e-01 : f32
    %31 = vector.broadcast %cst_18 : f32 to vector<32x256xf32>
    %32 = arith.addf %30, %31 : vector<32x256xf32>
    %33 = arith.addf %17, %32 : vector<32x256xf32>
    %34 = arith.mulf %0, %33 : vector<32x256xf32>
    %cst_19 = arith.constant 5.000000e-01 : f32
    %35 = vector.broadcast %cst_19 : f32 to vector<32x256xf32>
    %36 = arith.mulf %34, %35 : vector<32x256xf32>
    %c0_20 = arith.constant 0 : index
    %c0_21 = arith.constant 0 : index
    %37 = vector.load %arg5[%c0_20, %c0_21] : memref<32x256xf32, #tpu.memory_space<vmem>>, vector<32x256xf32>
    tpu.vector_store %arg5[%c0_20, %c0_21], %36 {strides = array<i32>} : memref<32x256xf32, #tpu.memory_space<vmem>>, vector<32x256xf32>,
    return
  }
  func.func @transform_0(%arg0: i32, %arg1: i32) -> (i32, i32) {
    %c0_i32 = arith.constant 0 : i32
    return %arg0, %arg1 : i32, i32
  }
  func.func @transform_1(%arg0: i32, %arg1: i32) -> (i32, i32) {
    %c0_i32 = arith.constant 0 : i32
    %c0_i32_0 = arith.constant 0 : i32
    %c0_i32_1 = arith.constant 0 : i32
    return %c0_i32, %c0_i32_0 : i32, i32
  }
  func.func @transform_2(%arg0: i32, %arg1: i32) -> (i32, i32, i32) {
    %c0_i32 = arith.constant 0 : i32
    %c0_i32_0 = arith.constant 0 : i32
    %c0_i32_1 = arith.constant 0 : i32
    %c0_i32_2 = arith.constant 0 : i32
    return %c0_i32, %c0_i32_0, %c0_i32_1 : i32, i32, i32
  }
  func.func @transform_3(%arg0: i32, %arg1: i32) -> (i32, i32) {
    %c0_i32 = arith.constant 0 : i32
    return %arg0, %arg1 : i32, i32
  }
}

</mosaic_0001>

<bundles_post_ra>
// kernel: tpu_custom_call.1
= control target key start
LH: loop header
LB: loop body
LE: loop exit
PB: predicated region body
PF: predicated region fallthrough
CT: control target
= control target key end

     0   :  { %8 = vsyncpa [#allocation3], 0  ;;  %s1261_s0 = inlined_call_operand.hbm [shape: f32[64,256], index: 0, kind: input, shape index: {}]   ;;  %s1262_s1 = inlined_call_operand.vmem [shape: f32[24,32], index: 1, kind: input, shape index: {}]   ;;  %s1263_s2 = inlined_call_operand.vmem [shape: f32[2,32,8], index: 2, kind: input, shape index: {}]   ;;  %s1264_s3 = inlined_call_operand.hbm [shape: f32[64,256], index: 3, kind: output, shape index: {}]  }
   0x1   :  { %10 = vsyncpa [#allocation3 + $0x1], 0 }
   0x2   :  { %11 = vsyncpa [#allocation4], 0 }
   0x3   :  { %13 = vsyncpa [#allocation4 + $0x1], 0  ;;  %s1016_s12 = smov 0   ;;  %s1018_s13 = smov 0  }
   0x4   :  { %s1020_s14 = smov 0   ;;  %s1022_s15 = smov 0  }
   0x5   :  { %s1024_s16 = smov 0   ;;  %s1026_s17 = smov 0  }
   0x6 LB: > { %s742_s18 = sadd.s32 4294967295, %s987_s17   ;;  %s743_s19 = sadd.s32 4294967294, %s987_s17   ;;  %s987_s17 = sphi %s1026_s17, %s19_s17   ;;  %s983_s16 = sphi %s1024_s16, %s1275_s16   ;;  %s979_s15 = sphi %s1022_s15, %s1274_s15   ;;  %s975_s14 = sphi %s1020_s14, %s1273_s14   ;;  %s971_s13 = sphi %s1018_s13, %s1272_s13   ;;  %s967_s12 = sphi %s1016_s12, %s1271_s12  }
   0x7   : > { %s31_s20 = sadd.s32 1, %s983_s16  ;;  %s40_s21 = sadd.s32 1, %s975_s14 }
   0x8   : > { %p33_p0 = scmp.ge.s32.totalorder %s31_s20, 2  ;;  %p47_p1 = scmp.ne.s32.totalorder %s975_s14, %s971_s13 }
   0x9   : > { %p48_p2 = scmp.eq.s32.totalorder %s987_s17, 0  ;;  %p53_p3 = scmp.ne.s32.totalorder %s971_s13, %s967_s12 }
   0xa   : > { %s1277_s20 = smov (%p33_p0, %s31_s20), 0  ;;  %p54_p5 = scmp.eq.s32.totalorder %s742_s18, 0 }
   0xb   : > { %p1057_p4 = por %p48_p2, %p47_p1  ;;  %s35_s23 = ssub.s32 %s983_s16, %s1277_s20 }
   0xc   : > { %p121_p6 = scmp.eq.s32.totalorder %s742_s18, 1  ;;  %p38_p7 = scmp.eq.s32.totalorder %s35_s23, 0 }
   0xd   : > { %p1063_p8 = por %p54_p5, %p53_p3  ;;  %p127_p10 = scmp.eq.s32.totalorder %s743_s19, 1 }
   0xe   : > { %p1067_p9 = por %p121_p6, %p47_p1  ;;  %p792_p13 = scmp.lt.s32.totalorder %s987_s17, 2 }
   0xf   : > { %s1072_s26 = scalar_select %p38_p7, %s975_s14, %s40_s21  }
  0x10   : > { %p1074_p11 = por %p127_p10, %p53_p3  ;;  %s153_s28 = sand.u32 1, %s975_s14  }
  0x11   : > { %s746_s29 = sshll.u32 %s153_s28, 6  ;;  %s775_s30 = sshll.u32 %s983_s16, 10 }
  0x12   : > { %s166_s6 = scalar_lea.hbm %s1261_s0, %s775_s30  ;;  %s157_s7 = scalar_lea.vmem [#allocation2], %s746_s29 }
  0x13   : > { %s167_s8 = sshll.u32 %s157_s7, 4  ;;  %p1087_p0 = pnand %p792_p13, %p1057_p4  ;;  %s168_s8 = int_to_ptr.vmem [resolvable:$true] %s167_s8 }
  0x14   : > { %p750_p1 = scmp.ge.s32.totalorder %s987_s17, 1  ;;  %s154_s10 = scalar_lea.sflag [#allocation3], %s153_s28 }
  0x15   : > { %p881_p2 = pneg %p1087_p0  ;;  %s892_s11 = scalar_lea.vmem %s168_s8, 1024 }
  0x16   : > { %p893_p3 = scmp.ne.s32.totalorder %s168_s8, %s892_s11  ;;  %s989_s18 = smov [#allocation2]  }
  0x17   : > { %s897_s19 = sshll.u32 %s989_s18, 4  ;;  %s898_s19 = int_to_ptr.vmem [resolvable:$false] %s897_s19 }
  0x18   : > { %p895_p5 = pnand %p893_p3, %p881_p2  ;;  %s899_s21 = scalar_lea.vmem %s898_s19, 2048 }
  0x19   : > { %p900_p7 = scmp.lt.s32.totalorder %s168_s8, %s898_s19  ;;  %p901_p10 = scmp.lt.s32.totalorder %s899_s21, %s892_s11 }
  0x1a   : > { %p896_p6 = pneg %p895_p5 }
  0x1b   : > { %p902_p12 = por %p901_p10, %p900_p7 }
  0x1d   : > { %p903_p4 = pnand %p902_p12, %p896_p6 }
  0x1f   : > { %906 = shalt.err (!%p903_p4)
}
  0x20   : > { %s990_s22 = smov 256   ;;  %s991_s23 = smov 16  }
  0x21   : > { %787 = dma.hbm_to_vmem [thread:$0]  (!%p1087_p0), %s166_s6, 1024, %s168_s8, %s154_s10, %s990_s22, %s990_s22, %s991_s23  }
  0x22   : > { %p175_p13 = scmp.lt.s32.totalorder %s987_s17, 3 }
  0x24   : > { %p176_p2 = pnand %p750_p1, %p175_p13 }
  0x25   : > { %s1100_s28 = sand.u32 (!%p176_p2), 1, %s971_s13  }
  0x26   : > { %179 = sbr.rel (%p176_p2) target bundleno = 512 (0x200), region = 32  ;;  %s751_s29 = sshll.u32 (!%p176_p2), %s1100_s28, 6 }
  0x27   : > { %s182_s30 = scalar_lea.sflag (!%p176_p2), [#allocation3], %s1100_s28  ;;  %s185_s4 = scalar_lea.vmem (!%p176_p2), [#allocation2], %s751_s29 }
  0x2b   : > { %958 = dma.done.wait (%p1063_p8), %s182_s30, 1024  }
  0x2c   : > { %960 = vsyncadd (%p1063_p8), %s182_s30, 4294966272  ;;  %v992_v0 = vmov 0.0   ;;  %v1112_v1 = vld [vmem:[%s185_s4 + $0x38] sm:$0xff]  ;;  %v1114_v2 = vld [vmem:[%s185_s4 + $0x30] sm:$0xff]  ;;  %vm223_vm0 = vcmask 261120   ;;  %vm322_vm1 = vcmask 64512  }
  0x2d   : > { %297 = vmatprep.mubr.f32.mxu0 %v992_v0  ;;  %405 = vmatprep.mubr.f32.mxu1 %v992_v0  ;;  %v1116_v3 = vld [vmem:[%s185_s4 + $0x28] sm:$0xff]  ;;  %v1119_v4 = vld [vmem:[%s185_s4 + $0x20] sm:$0xff]  ;;  %v1122_v5 = vld [vmem:[%s185_s4 + $0x18] sm:$0xff]  ;;  %s1191_s11 = scalar_lea.vmem [#allocation5], %s751_s29  ;;  %s777_s29 = sshll.u32 %s979_s15, 10 }
  0x2e   : > { %257 = vmatprep.subr.mxu0 %v1112_v1  ;;  %v1125_v6 = vld [vmem:[%s185_s4 + $0x10] sm:$0xff]  ;;  %v1128_v7 = vld [vmem:[%s185_s4 + $0x8] sm:$0xff]  ;;  %v1131_v8 = vld [vmem:[%s185_s4] sm:$0xff]  ;;  %s655_s18 = sshll.u32 %s1191_s11, 4  ;;  %s1209_s22 = scalar_lea.hbm %s1264_s3, %s777_s29  ;;  %s1211_s18 = int_to_ptr.vmem [resolvable:$true] %s655_s18 }
  0x2f   : > { %258 = vmatpush1.msra.mxu0 %v1114_v2  ;;  %v220_v9 = vld [vmem:[%s1262_s1] sm:$0xff]  ;;  %v221_v10 = vld [vmem:[%s1262_s1 + $0x8] sm:$0xff]  ;;  %v222_v11 = vld [vmem:[%s1262_s1 + $0x10] sm:$0xff]  ;;  %s639_s15 = scalar_lea.sflag [#allocation4], %s1100_s28  ;;  %s907_s23 = scalar_lea.vmem %s1211_s18, 1024 }
  0x30   : > { %259 = vmatprep.subr.mxu0 %v1116_v3  ;;  %v319_v17 = vld [vmem:[%s1263_s2 + $0x8] sm:$0xff]  ;;  %v318_v18 = vld [vmem:[%s1263_s2] sm:$0xff]  ;;  %v320_v21 = vld [vmem:[%s1263_s2 + $0x10] sm:$0xff]  ;;  %p908_p8 = scmp.ne.s32.totalorder %s1211_s18, %s907_s23  ;;  %s993_s30 = smov [#allocation5]  }
  0x31   : > { %260 = vmatpush1.msra.mxu0 %v1119_v4  ;;  %v321_v25 = vld [vmem:[%s1263_s2 + $0x18] sm:$0xff]  ;;  %v760_v28 = vld [vmem:[%s1263_s2 + $0x20] sm:$0xff]  ;;  %v761_v29 = vld [vmem:[%s1263_s2 + $0x28] sm:$0xff]  ;;  %s911_s4 = sshll.u32 %s993_s30, 4  ;;  %s912_s4 = int_to_ptr.vmem [resolvable:$false] %s911_s4 }
  0x32   : > { %261 = vmatprep.subr.mxu0 %v1122_v5  ;;  %v762_v30 = vld [vmem:[%s1263_s2 + $0x30] sm:$0xff]  ;;  %v763_v31 = vld [vmem:[%s1263_s2 + $0x38] sm:$0xff]  ;;  %p909_p12 = pnand %p908_p8, %p1067_p9  ;;  %s913_s24 = scalar_lea.vmem %s912_s4, 2048 }
  0x33   : > { %262 = vmatpush1.msra.mxu0 %v1125_v6  ;;  %p914_p1 = scmp.lt.s32.totalorder %s1211_s18, %s912_s4  ;;  %p915_p3 = scmp.lt.s32.totalorder %s913_s24, %s907_s23 }
  0x34   : > { %263 = vmatprep.subr.mxu0 %v1128_v7  ;;  %p910_p0 = pneg %p909_p12 }
  0x35   : > { %264 = vmatpush1.msra.mxu0 %v1131_v8  ;;  %p916_p5 = por %p915_p3, %p914_p1 }
  0x36   : > { %753 = vmatmul.mubr.msk.f32.vlgmr.msra.gmra.mxu0 %vm223_vm0, %v220_v9 }
  0x37   : > { %303 = vmatprep.mubr.f32.mxu0 %v992_v0  ;;  %p917_p6 = pnand %p916_p5, %p910_p0 }
  0x3a   : > { %754 = vmatmul.mubr.msk.f32.gmra.mxu0 %vm223_vm0, %v221_v10 }
  0x3b   : > { %309 = vmatprep.mubr.f32.mxu0 %v992_v0 }
  0x3e   : > { %755 = vmatmul.mubr.msk.f32.gmra.mxu0 %vm223_vm0, %v222_v11 }
  0x3f   : > { %399 = vmatprep.mubr.f32.mxu0 %v992_v0 }
  0xf6   : > { %v299_v12 = vpop.f32.mrf.mxu0 }
  0xf7   : > { %v316_v15 = vmax.f32 %v299_v12, 0.0 }
  0xf8   : > { %v301_v13 = vpop.f32.mrf.mxu0 }
  0xf9   : > { %v317_v14 = vmax.f32 %v301_v13, 0.0 }
  0xfa   : > { %v305_v16 = vpop.f32.mrf.mxu0 }
  0xfb   : > { %365 = vmatprep.subr.mxu0 %v317_v14  ;;  %778 = vmatprep.subr.mxu1 %v317_v14 }
  0xfc   : > { %v307_v19 = vpop.f32.mrf.mxu0  ;;  %366 = vmatpush1.msra.mxu0 %v316_v15  ;;  %779 = vmatpush1.msra.mxu1 %v316_v15 }
  0xfd   : > { %757 = vmatmul.mubr.msk.f32.vlgmr.msra.gmra.mxu1 %vm322_vm1, %v319_v17  ;;  %756 = vmatmul.mubr.msk.f32.vlgmr.msra.gmra.mxu0 %vm322_vm1, %v318_v18 }
  0xfe   : > { %v311_v20 = vpop.f32.mrf.mxu0  ;;  %411 = vmatprep.mubr.f32.mxu1 %v992_v0 }
  0xff   : > { %v464_v22 = vmul.f32 %v311_v20, %v305_v16 }
 0x100   : > { %v313_v23 = vpop.f32.mrf.mxu0 }
 0x101   : > { %v465_v24 = vmul.f32 %v313_v23, %v307_v19  ;;  %758 = vmatmul.mubr.msk.f32.gmra.mxu1 %vm322_vm1, %v320_v21  ;;  %v466_v27 = vmax.f32 %v464_v22, 0.0 }
 0x102   : > { %417 = vmatprep.mubr.f32.mxu1 %v992_v0 }
 0x103   : > { %v467_v26 = vmax.f32 %v465_v24, 0.0 }
 0x105   : > { %759 = vmatmul.mubr.msk.f32.gmra.mxu1 %vm322_vm1, %v321_v25  ;;  %515 = vmatprep.subr.mxu1 %v467_v26 }
 0x106   : > { %516 = vmatpush1.msra.mxu1 %v466_v27  ;;  %549 = vmatprep.mubr.f32.mxu1 %v992_v0 }
 0x109   : > { %764 = vmatmul.mubr.msk.f32.vlgmr.msra.gmra.mxu1 %vm322_vm1, %v760_v28 }
 0x10a   : > { %555 = vmatprep.mubr.f32.mxu1 %v992_v0 }
 0x10d   : > { %765 = vmatmul.mubr.msk.f32.gmra.mxu1 %vm322_vm1, %v761_v29 }
 0x10e   : > { %561 = vmatprep.mubr.f32.mxu1 %v992_v0 }
 0x111   : > { %766 = vmatmul.mubr.msk.f32.gmra.mxu1 %vm322_vm1, %v762_v30 }
 0x112   : > { %567 = vmatprep.mubr.f32.mxu1 %v992_v0 }
 0x115   : > { %767 = vmatmul.mubr.msk.f32.gmra.mxu1 %vm322_vm1, %v763_v31 }
 0x1bd   : > { %v407_v32 = vpop.f32.mrf.mxu1  ;;  %v401_v33 = vpop.f32.mrf.mxu0 }
 0x1be   : > { %v424_v37 = vmul.f32 0.5, %v401_v33  ;;  %v426_v41 = vmul.f32 0.5, %v407_v32 }
 0x1bf   : > { %v409_v34 = vpop.f32.mrf.mxu1  ;;  %v403_v36 = vpop.f32.mrf.mxu0 }
 0x1c0   : > { %v425_v39 = vmul.f32 0.5, %v403_v36  ;;  %847 = vtanh.f32 %v424_v37  ;;  %v427_v43 = vmul.f32 0.5, %v409_v34 }
 0x1c1   : > { %v413_v35 = vpop.f32.mrf.mxu1 }
 0x1c2   : > { %849 = vtanh.f32 %v425_v39  ;;  %v428_v46 = vmul.f32 0.5, %v413_v35 }
 0x1c3   : > { %v415_v38 = vpop.f32.mrf.mxu1  ;;  %851 = vtanh.f32 %v426_v41 }
 0x1c4   : > { %v429_v49 = vmul.f32 0.5, %v415_v38 }
 0x1c5   : > { %v419_v40 = vpop.f32.mrf.mxu1 }
 0x1c6   : > { %v430_v52 = vmul.f32 0.5, %v419_v40 }
 0x1c7   : > { %v421_v42 = vpop.f32.mrf.mxu1 }
 0x1c8   : > { %v431_v55 = vmul.f32 0.5, %v421_v42 }
 0x1c9   : > { %v551_v44 = vpop.f32.mrf.mxu1 }
 0x1ca   : > { %v574_v45 = vmul.f32 0.5, %v551_v44 }
 0x1cb   : > { %v553_v47 = vpop.f32.mrf.mxu1 }
 0x1cc   : > { %853 = vtanh.f32 %v574_v45  ;;  %v575_v48 = vmul.f32 0.5, %v553_v47 }
 0x1cd   : > { %855 = vtanh.f32 %v427_v43  ;;  %v557_v50 = vpop.f32.mrf.mxu1  ;;  %v848_v58 = vpop.eup %847 }
 0x1ce   : > { %857 = vtanh.f32 %v575_v48  ;;  %v576_v51 = vmul.f32 0.5, %v557_v50  ;;  %v440_v63 = vmul.f32 0.5, %v848_v58 }
 0x1cf   : > { %859 = vtanh.f32 %v428_v46  ;;  %v559_v53 = vpop.f32.mrf.mxu1  ;;  %v850_v61 = vpop.eup %849 }
 0x1d0   : > { %861 = vtanh.f32 %v576_v51  ;;  %v577_v54 = vmul.f32 0.5, %v559_v53  ;;  %v852_v10 = vpop.eup %851  ;;  %v441_v11 = vmul.f32 0.5, %v850_v61  ;;  %v448_v16 = vadd.f32 0.5, %v440_v63 }
 0x1d1   : > { %863 = vtanh.f32 %v429_v49  ;;  %v563_v56 = vpop.f32.mrf.mxu1  ;;  %v442_v18 = vmul.f32 0.5, %v852_v10 }
 0x1d2   : > { %865 = vtanh.f32 %v577_v54  ;;  %v578_v57 = vmul.f32 0.5, %v563_v56  ;;  %v449_v22 = vadd.f32 0.5, %v441_v11 }
 0x1d3   : > { %867 = vtanh.f32 %v430_v52  ;;  %v565_v59 = vpop.f32.mrf.mxu1  ;;  %v450_v30 = vadd.f32 0.5, %v442_v18 }
 0x1d4   : > { %869 = vtanh.f32 %v578_v57  ;;  %v579_v60 = vmul.f32 0.5, %v565_v59 }
 0x1d5   : > { %871 = vtanh.f32 %v431_v55  ;;  %v569_v62 = vpop.f32.mrf.mxu1 }
 0x1d6   : > { %873 = vtanh.f32 %v579_v60  ;;  %v580_v0 = vmul.f32 0.5, %v569_v62 }
 0x1d7   : > { %v571_v9 = vpop.f32.mrf.mxu1 }
 0x1d8   : > { %875 = vtanh.f32 %v580_v0  ;;  %v581_v12 = vmul.f32 0.5, %v571_v9 }
 0x1d9   : > { %v854_v13 = vpop.eup %853 }
 0x1da   : > { %v856_v14 = vpop.eup %855  ;;  %v590_v15 = vmul.f32 0.5, %v854_v13  ;;  %877 = vtanh.f32 %v581_v12 }
 0x1db   : > { %v858_v17 = vpop.eup %857  ;;  %v443_v24 = vmul.f32 0.5, %v856_v14 }
 0x1dc   : > { %v860_v19 = vpop.eup %859  ;;  %v598_v20 = vadd.f32 0.5, %v590_v15  ;;  %v591_v21 = vmul.f32 0.5, %v858_v17 }
 0x1dd   : > { %v862_v23 = vpop.eup %861  ;;  %v444_v31 = vmul.f32 0.5, %v860_v19  ;;  %v451_v38 = vadd.f32 0.5, %v443_v24 }
 0x1de   : > { %v864_v25 = vpop.eup %863  ;;  %v599_v26 = vadd.f32 0.5, %v591_v21  ;;  %v592_v27 = vmul.f32 0.5, %v862_v23  ;;  %v606_v28 = vadd.f32 %v598_v20, %v448_v16 }
 0x1df   : > { %v866_v29 = vpop.eup %865  ;;  %v445_v39 = vmul.f32 0.5, %v864_v25  ;;  %v452_v46 = vadd.f32 0.5, %v444_v31 }
 0x1e0   : > { %v868_v32 = vpop.eup %867  ;;  %v600_v33 = vadd.f32 0.5, %v592_v27  ;;  %v593_v34 = vmul.f32 0.5, %v866_v29  ;;  %v614_v35 = vmul.f32 %v606_v28, %v1131_v8  ;;  %v607_v36 = vadd.f32 %v599_v26, %v449_v22 }
 0x1e1   : > { %v870_v37 = vpop.eup %869  ;;  %v453_v52 = vadd.f32 0.5, %v445_v39  ;;  %v446_v53 = vmul.f32 0.5, %v868_v32 }
 0x1e2   : > { %v872_v40 = vpop.eup %871  ;;  %v608_v41 = vadd.f32 %v600_v33, %v450_v30  ;;  %v601_v42 = vadd.f32 0.5, %v593_v34  ;;  %v622_v43 = vmul.f32 0.5, %v614_v35  ;;  %v594_v44 = vmul.f32 0.5, %v870_v37 }
 0x1e3   : > { %v874_v45 = vpop.eup %873  ;;  %v615_v47 = vmul.f32 %v607_v36, %v1128_v7  ;;  %v447_v54 = vmul.f32 0.5, %v872_v40  ;;  %v454_v0 = vadd.f32 0.5, %v446_v53 }
 0x1e4   : > { %v616_v48 = vmul.f32 %v608_v41, %v1125_v6  ;;  %v609_v49 = vadd.f32 %v601_v42, %v451_v38  ;;  %630 = vst [vmem:[%s1191_s11] sm:$0xff] %v622_v43  ;;  %v602_v8 = vadd.f32 0.5, %v594_v44  ;;  %v595_v50 = vmul.f32 0.5, %v874_v45 }
 0x1e5   : > { %v876_v51 = vpop.eup %875  ;;  %v623_v55 = vmul.f32 0.5, %v615_v47  ;;  %v455_v10 = vadd.f32 0.5, %v447_v54 }
 0x1e6   : > { %v624_v56 = vmul.f32 0.5, %v616_v48  ;;  %v617_v7 = vmul.f32 %v609_v49, %v1122_v5  ;;  %v610_v6 = vadd.f32 %v602_v8, %v452_v46  ;;  %v603_v57 = vadd.f32 0.5, %v595_v50 }
 0x1e7   : > { %v878_v58 = vpop.eup %877  ;;  %631 = vst [vmem:[%s1191_s11 + $0x8] sm:$0xff] %v623_v55  ;;  %v596_v59 = vmul.f32 0.5, %v876_v51 }
 0x1e8   : > { %632 = vst [vmem:[%s1191_s11 + $0x10] sm:$0xff] %v624_v56  ;;  %v625_v60 = vmul.f32 0.5, %v617_v7  ;;  %v618_v61 = vmul.f32 %v610_v6, %v1119_v4  ;;  %v611_v62 = vadd.f32 %v603_v57, %v453_v52  ;;  %v597_v63 = vmul.f32 0.5, %v878_v58 }
 0x1e9   : > { %v604_v9 = vadd.f32 0.5, %v596_v59 }
 0x1ea   : > { %633 = vst [vmem:[%s1191_s11 + $0x18] sm:$0xff] %v625_v60  ;;  %v626_v5 = vmul.f32 0.5, %v618_v61  ;;  %v619_v11 = vmul.f32 %v611_v62, %v1116_v3  ;;  %v605_v12 = vadd.f32 0.5, %v597_v63 }
 0x1eb   : > { %v612_v13 = vadd.f32 %v604_v9, %v454_v0 }
 0x1ec   : > { %634 = vst [vmem:[%s1191_s11 + $0x20] sm:$0xff] %v626_v5  ;;  %v627_v14 = vmul.f32 0.5, %v619_v11  ;;  %v613_v15 = vadd.f32 %v605_v12, %v455_v10 }
 0x1ed   : > { %v620_v4 = vmul.f32 %v612_v13, %v1114_v2 }
 0x1ee   : > { %635 = vst [vmem:[%s1191_s11 + $0x28] sm:$0xff] %v627_v14  ;;  %v621_v16 = vmul.f32 %v613_v15, %v1112_v1 }
 0x1ef   : > { %v628_v17 = vmul.f32 0.5, %v620_v4 }
 0x1f0   : > { %v629_v3 = vmul.f32 0.5, %v621_v16 }
 0x1f1   : > { %636 = vst [vmem:[%s1191_s11 + $0x30] sm:$0xff] %v628_v17 }
 0x1f2   : > { %637 = vst [vmem:[%s1191_s11 + $0x38] sm:$0xff] %v629_v3 }
 0x1f3   : > { %920 = shalt.err (!%p917_p6)
}
 0x1f4   : > { %s921_s5 = scalar_lea.hbm %s1209_s22, 1024  ;;  %s925_s8 = scalar_lea.hbm %s1264_s3, 2048 }
 0x1f5   : > { %p922_p7 = scmp.ne.s32.totalorder %s1209_s22, %s921_s5  ;;  %p926_p13 = scmp.lt.s32.totalorder %s1209_s22, %s1264_s3 }
 0x1f6   : > { %p927_p2 = scmp.lt.s32.totalorder %s925_s8, %s921_s5 }
 0x1f7   : > { %p923_p10 = pnand %p922_p7, %p1067_p9 }
 0x1f8   : > { %p928_p8 = por %p927_p2, %p926_p13 }
 0x1f9   : > { %p924_p4 = pneg %p923_p10 }
 0x1fb   : > { %p929_p12 = pnand %p928_p8, %p924_p4 }
 0x1fd   : > { %932 = shalt.err (!%p929_p12)
}
 0x1fe   : > { %s994_s11 = smov 256   ;;  %s995_s29 = smov 16  }
 0x1ff   : > { %782 = dma.vmem_to_hbm [thread:$0]  (%p1067_p9), %s1211_s18, 1024, %s1209_s22, %s639_s15, %s994_s11, %s994_s11, %s995_s29  }
 0x200 PF: > { %s670_s19 = sand.u32 1, %s967_s12   ;;  %p1270_p0 = scmp.ge.s32.totalorder %s987_s17, 2 }
 0x201   : > { %s671_s21 = scalar_lea.sflag [#allocation4], %s670_s19 }
 0x202   : > { %p789_p1 = pnand %p1270_p0, %p1074_p11 }
 0x204   : > { %p790_p3 = pneg %p789_p1 }
 0x206   : > { %962 = dma.done.wait (%p790_p3), %s671_s21, 1024  }
 0x207   : > { %964 = vsyncadd (%p790_p3), %s671_s21, 4294966272  ;;  %s19_s17 = sadd.s32 1, %s987_s17   ;;  %s1271_s12 = smov %s971_s13 }
 0x208   : > { %p16_p5 = scmp.ge.s32.totalorder %s19_s17, 4   ;;  %s1272_s13 = smov %s975_s14 }
 0x209   : > { %s1273_s14 = smov %s1072_s26  ;;  %s1274_s15 = smov %s983_s16 }
 0x20a   : > { %s1275_s16 = smov %s1277_s20  ;;  %18 = sbr.rel (!%p16_p5) target bundleno = 6 (0x6), region = 78 }
 0x20f   :  { %676 = vsyncpa [#allocation3], 1 }
 0x210   :  { %678 = vsyncpa [#allocation3 + $0x1], 1 }
 0x211   :  { %679 = vsyncpa [#allocation4], 1 }
 0x212   :  { %681 = vsyncpa [#allocation4 + $0x1], 1 }

// kernel: tpu_custom_call.1
= control target key start
LH: loop header
LB: loop body
LE: loop exit
PB: predicated region body
PF: predicated region fallthrough
CT: control target
= control target key end

     0   :  { %8 = vsyncpa [#allocation3], 0  ;;  %s1261_s0 = inlined_call_operand.hbm [shape: f32[64,256], index: 0, kind: input, shape index: {}]   ;;  %s1262_s1 = inlined_call_operand.vmem [shape: f32[24,32], index: 1, kind: input, shape index: {}]   ;;  %s1263_s2 = inlined_call_operand.vmem [shape: f32[2,32,8], index: 2, kind: input, shape index: {}]   ;;  %s1264_s3 = inlined_call_operand.hbm [shape: f32[64,256], index: 3, kind: output, shape index: {}]  }
   0x1   :  { %10 = vsyncpa [#allocation3 + $0x1], 0 }
   0x2   :  { %11 = vsyncpa [#allocation4], 0 }
   0x3   :  { %13 = vsyncpa [#allocation4 + $0x1], 0  ;;  %s1016_s12 = smov 0   ;;  %s1018_s13 = smov 0  }
   0x4   :  { %s1020_s14 = smov 0   ;;  %s1022_s15 = smov 0  }
   0x5   :  { %s1024_s16 = smov 0   ;;  %s1026_s17 = smov 0  }
   0x6 LB: > { %s742_s18 = sadd.s32 4294967295, %s987_s17   ;;  %s743_s19 = sadd.s32 4294967294, %s987_s17   ;;  %s987_s17 = sphi %s1026_s17, %s19_s17   ;;  %s983_s16 = sphi %s1024_s16, %s1275_s16   ;;  %s979_s15 = sphi %s1022_s15, %s1274_s15   ;;  %s975_s14 = sphi %s1020_s14, %s1273_s14   ;;  %s971_s13 = sphi %s1018_s13, %s1272_s13   ;;  %s967_s12 = sphi %s1016_s12, %s1271_s12  }
   0x7   : > { %s31_s20 = sadd.s32 1, %s983_s16  ;;  %s40_s21 = sadd.s32 1, %s975_s14 }
   0x8   : > { %p33_p0 = scmp.ge.s32.totalorder %s31_s20, 2  ;;  %p47_p1 = scmp.ne.s32.totalorder %s975_s14, %s971_s13 }
   0x9   : > { %p48_p2 = scmp.eq.s32.totalorder %s987_s17, 0  ;;  %p53_p3 = scmp.ne.s32.totalorder %s971_s13, %s967_s12 }
   0xa   : > { %s1277_s20 = smov (%p33_p0, %s31_s20), 0  ;;  %p54_p5 = scmp.eq.s32.totalorder %s742_s18, 0 }
   0xb   : > { %p1057_p4 = por %p48_p2, %p47_p1  ;;  %s35_s23 = ssub.s32 %s983_s16, %s1277_s20 }
   0xc   : > { %p121_p6 = scmp.eq.s32.totalorder %s742_s18, 1  ;;  %p38_p7 = scmp.eq.s32.totalorder %s35_s23, 0 }
   0xd   : > { %p1063_p8 = por %p54_p5, %p53_p3  ;;  %p127_p10 = scmp.eq.s32.totalorder %s743_s19, 1 }
   0xe   : > { %p1067_p9 = por %p121_p6, %p47_p1  ;;  %p792_p13 = scmp.lt.s32.totalorder %s987_s17, 2 }
   0xf   : > { %s1072_s26 = scalar_select %p38_p7, %s975_s14, %s40_s21  }
  0x10   : > { %p1074_p11 = por %p127_p10, %p53_p3  ;;  %s153_s28 = sand.u32 1, %s975_s14  }
  0x11   : > { %s746_s29 = sshll.u32 %s153_s28, 6  ;;  %s775_s30 = sshll.u32 %s983_s16, 10 }
  0x12   : > { %s166_s6 = scalar_lea.hbm %s1261_s0, %s775_s30  ;;  %s157_s7 = scalar_lea.vmem [#allocation2], %s746_s29 }
  0x13   : > { %s167_s8 = sshll.u32 %s157_s7, 4  ;;  %p1087_p0 = pnand %p792_p13, %p1057_p4  ;;  %s168_s8 = int_to_ptr.vmem [resolvable:$true] %s167_s8 }
  0x14   : > { %p750_p1 = scmp.ge.s32.totalorder %s987_s17, 1  ;;  %s154_s10 = scalar_lea.sflag [#allocation3], %s153_s28 }
  0x15   : > { %p881_p2 = pneg %p1087_p0  ;;  %s892_s11 = scalar_lea.vmem %s168_s8, 1024 }
  0x16   : > { %p893_p3 = scmp.ne.s32.totalorder %s168_s8, %s892_s11  ;;  %s989_s18 = smov [#allocation2]  }
  0x17   : > { %s897_s19 = sshll.u32 %s989_s18, 4  ;;  %s898_s19 = int_to_ptr.vmem [resolvable:$false] %s897_s19 }
  0x18   : > { %p895_p5 = pnand %p893_p3, %p881_p2  ;;  %s899_s21 = scalar_lea.vmem %s898_s19, 2048 }
  0x19   : > { %p900_p7 = scmp.lt.s32.totalorder %s168_s8, %s898_s19  ;;  %p901_p10 = scmp.lt.s32.totalorder %s899_s21, %s892_s11 }
  0x1a   : > { %p896_p6 = pneg %p895_p5 }
  0x1b   : > { %p902_p12 = por %p901_p10, %p900_p7 }
  0x1d   : > { %p903_p4 = pnand %p902_p12, %p896_p6 }
  0x1f   : > { %906 = shalt.err (!%p903_p4)
}
  0x20   : > { %s990_s22 = smov 256   ;;  %s991_s23 = smov 16  }
  0x21   : > { %787 = dma.hbm_to_vmem [thread:$0]  (!%p1087_p0), %s166_s6, 1024, %s168_s8, %s154_s10, %s990_s22, %s990_s22, %s991_s23  }
  0x22   : > { %p175_p13 = scmp.lt.s32.totalorder %s987_s17, 3 }
  0x24   : > { %p176_p2 = pnand %p750_p1, %p175_p13 }
  0x25   : > { %s1100_s28 = sand.u32 (!%p176_p2), 1, %s971_s13  }
  0x26   : > { %179 = sbr.rel (%p176_p2) target bundleno = 512 (0x200), region = 32  ;;  %s751_s29 = sshll.u32 (!%p176_p2), %s1100_s28, 6 }
  0x27   : > { %s182_s30 = scalar_lea.sflag (!%p176_p2), [#allocation3], %s1100_s28  ;;  %s185_s4 = scalar_lea.vmem (!%p176_p2), [#allocation2], %s751_s29 }
  0x2b   : > { %958 = dma.done.wait (%p1063_p8), %s182_s30, 1024  }
  0x2c   : > { %960 = vsyncadd (%p1063_p8), %s182_s30, 4294966272  ;;  %v992_v0 = vmov 0.0   ;;  %v1112_v1 = vld [vmem:[%s185_s4 + $0x38] sm:$0xff]  ;;  %v1114_v2 = vld [vmem:[%s185_s4 + $0x30] sm:$0xff]  ;;  %vm223_vm0 = vcmask 261120   ;;  %vm322_vm1 = vcmask 64512  }
  0x2d   : > { %297 = vmatprep.mubr.f32.mxu0 %v992_v0  ;;  %405 = vmatprep.mubr.f32.mxu1 %v992_v0  ;;  %v1116_v3 = vld [vmem:[%s185_s4 + $0x28] sm:$0xff]  ;;  %v1119_v4 = vld [vmem:[%s185_s4 + $0x20] sm:$0xff]  ;;  %v1122_v5 = vld [vmem:[%s185_s4 + $0x18] sm:$0xff]  ;;  %s1191_s11 = scalar_lea.vmem [#allocation5], %s751_s29  ;;  %s777_s29 = sshll.u32 %s979_s15, 10 }
  0x2e   : > { %257 = vmatprep.subr.mxu0 %v1112_v1  ;;  %v1125_v6 = vld [vmem:[%s185_s4 + $0x10] sm:$0xff]  ;;  %v1128_v7 = vld [vmem:[%s185_s4 + $0x8] sm:$0xff]  ;;  %v1131_v8 = vld [vmem:[%s185_s4] sm:$0xff]  ;;  %s655_s18 = sshll.u32 %s1191_s11, 4  ;;  %s1209_s22 = scalar_lea.hbm %s1264_s3, %s777_s29  ;;  %s1211_s18 = int_to_ptr.vmem [resolvable:$true] %s655_s18 }
  0x2f   : > { %258 = vmatpush1.msra.mxu0 %v1114_v2  ;;  %v220_v9 = vld [vmem:[%s1262_s1] sm:$0xff]  ;;  %v221_v10 = vld [vmem:[%s1262_s1 + $0x8] sm:$0xff]  ;;  %v222_v11 = vld [vmem:[%s1262_s1 + $0x10] sm:$0xff]  ;;  %s639_s15 = scalar_lea.sflag [#allocation4], %s1100_s28  ;;  %s907_s23 = scalar_lea.vmem %s1211_s18, 1024 }
  0x30   : > { %259 = vmatprep.subr.mxu0 %v1116_v3  ;;  %v319_v17 = vld [vmem:[%s1263_s2 + $0x8] sm:$0xff]  ;;  %v318_v18 = vld [vmem:[%s1263_s2] sm:$0xff]  ;;  %v320_v21 = vld [vmem:[%s1263_s2 + $0x10] sm:$0xff]  ;;  %p908_p8 = scmp.ne.s32.totalorder %s1211_s18, %s907_s23  ;;  %s993_s30 = smov [#allocation5]  }
  0x31   : > { %260 = vmatpush1.msra.mxu0 %v1119_v4  ;;  %v321_v25 = vld [vmem:[%s1263_s2 + $0x18] sm:$0xff]  ;;  %v760_v28 = vld [vmem:[%s1263_s2 + $0x20] sm:$0xff]  ;;  %v761_v29 = vld [vmem:[%s1263_s2 + $0x28] sm:$0xff]  ;;  %s911_s4 = sshll.u32 %s993_s30, 4  ;;  %s912_s4 = int_to_ptr.vmem [resolvable:$false] %s911_s4 }
  0x32   : > { %261 = vmatprep.subr.mxu0 %v1122_v5  ;;  %v762_v30 = vld [vmem:[%s1263_s2 + $0x30] sm:$0xff]  ;;  %v763_v31 = vld [vmem:[%s1263_s2 + $0x38] sm:$0xff]  ;;  %p909_p12 = pnand %p908_p8, %p1067_p9  ;;  %s913_s24 = scalar_lea.vmem %s912_s4, 2048 }
  0x33   : > { %262 = vmatpush1.msra.mxu0 %v1125_v6  ;;  %p914_p1 = scmp.lt.s32.totalorder %s1211_s18, %s912_s4  ;;  %p915_p3 = scmp.lt.s32.totalorder %s913_s24, %s907_s23 }
  0x34   : > { %263 = vmatprep.subr.mxu0 %v1128_v7  ;;  %p910_p0 = pneg %p909_p12 }
  0x35   : > { %264 = vmatpush1.msra.mxu0 %v1131_v8  ;;  %p916_p5 = por %p915_p3, %p914_p1 }
  0x36   : > { %753 = vmatmul.mubr.msk.f32.vlgmr.msra.gmra.mxu0 %vm223_vm0, %v220_v9 }
  0x37   : > { %303 = vmatprep.mubr.f32.mxu0 %v992_v0  ;;  %p917_p6 = pnand %p916_p5, %p910_p0 }
  0x3a   : > { %754 = vmatmul.mubr.msk.f32.gmra.mxu0 %vm223_vm0, %v221_v10 }
  0x3b   : > { %309 = vmatprep.mubr.f32.mxu0 %v992_v0 }
  0x3e   : > { %755 = vmatmul.mubr.msk.f32.gmra.mxu0 %vm223_vm0, %v222_v11 }
  0x3f   : > { %399 = vmatprep.mubr.f32.mxu0 %v992_v0 }
  0xf6   : > { %v299_v12 = vpop.f32.mrf.mxu0 }
  0xf7   : > { %v316_v15 = vmax.f32 %v299_v12, 0.0 }
  0xf8   : > { %v301_v13 = vpop.f32.mrf.mxu0 }
  0xf9   : > { %v317_v14 = vmax.f32 %v301_v13, 0.0 }
  0xfa   : > { %v305_v16 = vpop.f32.mrf.mxu0 }
  0xfb   : > { %365 = vmatprep.subr.mxu0 %v317_v14  ;;  %778 = vmatprep.subr.mxu1 %v317_v14 }
  0xfc   : > { %v307_v19 = vpop.f32.mrf.mxu0  ;;  %366 = vmatpush1.msra.mxu0 %v316_v15  ;;  %779 = vmatpush1.msra.mxu1 %v316_v15 }
  0xfd   : > { %757 = vmatmul.mubr.msk.f32.vlgmr.msra.gmra.mxu1 %vm322_vm1, %v319_v17  ;;  %756 = vmatmul.mubr.msk.f32.vlgmr.msra.gmra.mxu0 %vm322_vm1, %v318_v18 }
  0xfe   : > { %v311_v20 = vpop.f32.mrf.mxu0  ;;  %411 = vmatprep.mubr.f32.mxu1 %v992_v0 }
  0xff   : > { %v464_v22 = vmul.f32 %v311_v20, %v305_v16 }
 0x100   : > { %v313_v23 = vpop.f32.mrf.mxu0 }
 0x101   : > { %v465_v24 = vmul.f32 %v313_v23, %v307_v19  ;;  %758 = vmatmul.mubr.msk.f32.gmra.mxu1 %vm322_vm1, %v320_v21  ;;  %v466_v27 = vmax.f32 %v464_v22, 0.0 }
 0x102   : > { %417 = vmatprep.mubr.f32.mxu1 %v992_v0 }
 0x103   : > { %v467_v26 = vmax.f32 %v465_v24, 0.0 }
 0x105   : > { %759 = vmatmul.mubr.msk.f32.gmra.mxu1 %vm322_vm1, %v321_v25  ;;  %515 = vmatprep.subr.mxu1 %v467_v26 }
 0x106   : > { %516 = vmatpush1.msra.mxu1 %v466_v27  ;;  %549 = vmatprep.mubr.f32.mxu1 %v992_v0 }
 0x109   : > { %764 = vmatmul.mubr.msk.f32.vlgmr.msra.gmra.mxu1 %vm322_vm1, %v760_v28 }
 0x10a   : > { %555 = vmatprep.mubr.f32.mxu1 %v992_v0 }
 0x10d   : > { %765 = vmatmul.mubr.msk.f32.gmra.mxu1 %vm322_vm1, %v761_v29 }
 0x10e   : > { %561 = vmatprep.mubr.f32.mxu1 %v992_v0 }
 0x111   : > { %766 = vmatmul.mubr.msk.f32.gmra.mxu1 %vm322_vm1, %v762_v30 }
 0x112   : > { %567 = vmatprep.mubr.f32.mxu1 %v992_v0 }
 0x115   : > { %767 = vmatmul.mubr.msk.f32.gmra.mxu1 %vm322_vm1, %v763_v31 }
 0x1bd   : > { %v407_v32 = vpop.f32.mrf.mxu1  ;;  %v401_v33 = vpop.f32.mrf.mxu0 }
 0x1be   : > { %v424_v37 = vmul.f32 0.5, %v401_v33  ;;  %v426_v41 = vmul.f32 0.5, %v407_v32 }
 0x1bf   : > { %v409_v34 = vpop.f32.mrf.mxu1  ;;  %v403_v36 = vpop.f32.mrf.mxu0 }
 0x1c0   : > { %v425_v39 = vmul.f32 0.5, %v403_v36  ;;  %847 = vtanh.f32 %v424_v37  ;;  %v427_v43 = vmul.f32 0.5, %v409_v34 }
 0x1c1   : > { %v413_v35 = vpop.f32.mrf.mxu1 }
 0x1c2   : > { %849 = vtanh.f32 %v425_v39  ;;  %v428_v46 = vmul.f32 0.5, %v413_v35 }
 0x1c3   : > { %v415_v38 = vpop.f32.mrf.mxu1  ;;  %851 = vtanh.f32 %v426_v41 }
 0x1c4   : > { %v429_v49 = vmul.f32 0.5, %v415_v38 }
 0x1c5   : > { %v419_v40 = vpop.f32.mrf.mxu1 }
 0x1c6   : > { %v430_v52 = vmul.f32 0.5, %v419_v40 }
 0x1c7   : > { %v421_v42 = vpop.f32.mrf.mxu1 }
 0x1c8   : > { %v431_v55 = vmul.f32 0.5, %v421_v42 }
 0x1c9   : > { %v551_v44 = vpop.f32.mrf.mxu1 }
 0x1ca   : > { %v574_v45 = vmul.f32 0.5, %v551_v44 }
 0x1cb   : > { %v553_v47 = vpop.f32.mrf.mxu1 }
 0x1cc   : > { %853 = vtanh.f32 %v574_v45  ;;  %v575_v48 = vmul.f32 0.5, %v553_v47 }
 0x1cd   : > { %855 = vtanh.f32 %v427_v43  ;;  %v557_v50 = vpop.f32.mrf.mxu1  ;;  %v848_v58 = vpop.eup %847 }
 0x1ce   : > { %857 = vtanh.f32 %v575_v48  ;;  %v576_v51 = vmul.f32 0.5, %v557_v50  ;;  %v440_v63 = vmul.f32 0.5, %v848_v58 }
 0x1cf   : > { %859 = vtanh.f32 %v428_v46  ;;  %v559_v53 = vpop.f32.mrf.mxu1  ;;  %v850_v61 = vpop.eup %849 }
 0x1d0   : > { %861 = vtanh.f32 %v576_v51  ;;  %v577_v54 = vmul.f32 0.5, %v559_v53  ;;  %v852_v10 = vpop.eup %851  ;;  %v441_v11 = vmul.f32 0.5, %v850_v61  ;;  %v448_v16 = vadd.f32 0.5, %v440_v63 }
 0x1d1   : > { %863 = vtanh.f32 %v429_v49  ;;  %v563_v56 = vpop.f32.mrf.mxu1  ;;  %v442_v18 = vmul.f32 0.5, %v852_v10 }
 0x1d2   : > { %865 = vtanh.f32 %v577_v54  ;;  %v578_v57 = vmul.f32 0.5, %v563_v56  ;;  %v449_v22 = vadd.f32 0.5, %v441_v11 }
 0x1d3   : > { %867 = vtanh.f32 %v430_v52  ;;  %v565_v59 = vpop.f32.mrf.mxu1  ;;  %v450_v30 = vadd.f32 0.5, %v442_v18 }
 0x1d4   : > { %869 = vtanh.f32 %v578_v57  ;;  %v579_v60 = vmul.f32 0.5, %v565_v59 }
 0x1d5   : > { %871 = vtanh.f32 %v431_v55  ;;  %v569_v62 = vpop.f32.mrf.mxu1 }
 0x1d6   : > { %873 = vtanh.f32 %v579_v60  ;;  %v580_v0 = vmul.f32 0.5, %v569_v62 }
 0x1d7   : > { %v571_v9 = vpop.f32.mrf.mxu1 }
 0x1d8   : > { %875 = vtanh.f32 %v580_v0  ;;  %v581_v12 = vmul.f32 0.5, %v571_v9 }
 0x1d9   : > { %v854_v13 = vpop.eup %853 }
 0x1da   : > { %v856_v14 = vpop.eup %855  ;;  %v590_v15 = vmul.f32 0.5, %v854_v13  ;;  %877 = vtanh.f32 %v581_v12 }
 0x1db   : > { %v858_v17 = vpop.eup %857  ;;  %v443_v24 = vmul.f32 0.5, %v856_v14 }
 0x1dc   : > { %v860_v19 = vpop.eup %859  ;;  %v598_v20 = vadd.f32 0.5, %v590_v15  ;;  %v591_v21 = vmul.f32 0.5, %v858_v17 }
 0x1dd   : > { %v862_v23 = vpop.eup %861  ;;  %v444_v31 = vmul.f32 0.5, %v860_v19  ;;  %v451_v38 = vadd.f32 0.5, %v443_v24 }
 0x1de   : > { %v864_v25 = vpop.eup %863  ;;  %v599_v26 = vadd.f32 0.5, %v591_v21  ;;  %v592_v27 = vmul.f32 0.5, %v862_v23  ;;  %v606_v28 = vadd.f32 %v598_v20, %v448_v16 }
 0x1df   : > { %v866_v29 = vpop.eup %865  ;;  %v445_v39 = vmul.f32 0.5, %v864_v25  ;;  %v452_v46 = vadd.f32 0.5, %v444_v31 }
 0x1e0   : > { %v868_v32 = vpop.eup %867  ;;  %v600_v33 = vadd.f32 0.5, %v592_v27  ;;  %v593_v34 = vmul.f32 0.5, %v866_v29  ;;  %v614_v35 = vmul.f32 %v606_v28, %v1131_v8  ;;  %v607_v36 = vadd.f32 %v599_v26, %v449_v22 }
 0x1e1   : > { %v870_v37 = vpop.eup %869  ;;  %v453_v52 = vadd.f32 0.5, %v445_v39  ;;  %v446_v53 = vmul.f32 0.5, %v868_v32 }
 0x1e2   : > { %v872_v40 = vpop.eup %871  ;;  %v608_v41 = vadd.f32 %v600_v33, %v450_v30  ;;  %v601_v42 = vadd.f32 0.5, %v593_v34  ;;  %v622_v43 = vmul.f32 0.5, %v614_v35  ;;  %v594_v44 = vmul.f32 0.5, %v870_v37 }
 0x1e3   : > { %v874_v45 = vpop.eup %873  ;;  %v615_v47 = vmul.f32 %v607_v36, %v1128_v7  ;;  %v447_v54 = vmul.f32 0.5, %v872_v40  ;;  %v454_v0 = vadd.f32 0.5, %v446_v53 }
 0x1e4   : > { %v616_v48 = vmul.f32 %v608_v41, %v1125_v6  ;;  %v609_v49 = vadd.f32 %v601_v42, %v451_v38  ;;  %630 = vst [vmem:[%s1191_s11] sm:$0xff] %v622_v43  ;;  %v602_v8 = vadd.f32 0.5, %v594_v44  ;;  %v595_v50 = vmul.f32 0.5, %v874_v45 }
 0x1e5   : > { %v876_v51 = vpop.eup %875  ;;  %v623_v55 = vmul.f32 0.5, %v615_v47  ;;  %v455_v10 = vadd.f32 0.5, %v447_v54 }
 0x1e6   : > { %v624_v56 = vmul.f32 0.5, %v616_v48  ;;  %v617_v7 = vmul.f32 %v609_v49, %v1122_v5  ;;  %v610_v6 = vadd.f32 %v602_v8, %v452_v46  ;;  %v603_v57 = vadd.f32 0.5, %v595_v50 }
 0x1e7   : > { %v878_v58 = vpop.eup %877  ;;  %631 = vst [vmem:[%s1191_s11 + $0x8] sm:$0xff] %v623_v55  ;;  %v596_v59 = vmul.f32 0.5, %v876_v51 }
 0x1e8   : > { %632 = vst [vmem:[%s1191_s11 + $0x10] sm:$0xff] %v624_v56  ;;  %v625_v60 = vmul.f32 0.5, %v617_v7  ;;  %v618_v61 = vmul.f32 %v610_v6, %v1119_v4  ;;  %v611_v62 = vadd.f32 %v603_v57, %v453_v52  ;;  %v597_v63 = vmul.f32 0.5, %v878_v58 }
 0x1e9   : > { %v604_v9 = vadd.f32 0.5, %v596_v59 }
 0x1ea   : > { %633 = vst [vmem:[%s1191_s11 + $0x18] sm:$0xff] %v625_v60  ;;  %v626_v5 = vmul.f32 0.5, %v618_v61  ;;  %v619_v11 = vmul.f32 %v611_v62, %v1116_v3  ;;  %v605_v12 = vadd.f32 0.5, %v597_v63 }
 0x1eb   : > { %v612_v13 = vadd.f32 %v604_v9, %v454_v0 }
 0x1ec   : > { %634 = vst [vmem:[%s1191_s11 + $0x20] sm:$0xff] %v626_v5  ;;  %v627_v14 = vmul.f32 0.5, %v619_v11  ;;  %v613_v15 = vadd.f32 %v605_v12, %v455_v10 }
 0x1ed   : > { %v620_v4 = vmul.f32 %v612_v13, %v1114_v2 }
 0x1ee   : > { %635 = vst [vmem:[%s1191_s11 + $0x28] sm:$0xff] %v627_v14  ;;  %v621_v16 = vmul.f32 %v613_v15, %v1112_v1 }
 0x1ef   : > { %v628_v17 = vmul.f32 0.5, %v620_v4 }
 0x1f0   : > { %v629_v3 = vmul.f32 0.5, %v621_v16 }
 0x1f1   : > { %636 = vst [vmem:[%s1191_s11 + $0x30] sm:$0xff] %v628_v17 }
 0x1f2   : > { %637 = vst [vmem:[%s1191_s11 + $0x38] sm:$0xff] %v629_v3 }
 0x1f3   : > { %920 = shalt.err (!%p917_p6)
}
 0x1f4   : > { %s921_s5 = scalar_lea.hbm %s1209_s22, 1024  ;;  %s925_s8 = scalar_lea.hbm %s1264_s3, 2048 }
 0x1f5   : > { %p922_p7 = scmp.ne.s32.totalorder %s1209_s22, %s921_s5  ;;  %p926_p13 = scmp.lt.s32.totalorder %s1209_s22, %s1264_s3 }
 0x1f6   : > { %p927_p2 = scmp.lt.s32.totalorder %s925_s8, %s921_s5 }
 0x1f7   : > { %p923_p10 = pnand %p922_p7, %p1067_p9 }
 0x1f8   : > { %p928_p8 = por %p927_p2, %p926_p13 }
 0x1f9   : > { %p924_p4 = pneg %p923_p10 }
 0x1fb   : > { %p929_p12 = pnand %p928_p8, %p924_p4 }
 0x1fd   : > { %932 = shalt.err (!%p929_p12)
}
 0x1fe   : > { %s994_s11 = smov 256   ;;  %s995_s29 = smov 16  }
 0x1ff   : > { %782 = dma.vmem_to_hbm [thread:$0]  (%p1067_p9), %s1211_s18, 1024, %s1209_s22, %s639_s15, %s994_s11, %s994_s11, %s995_s29  }
 0x200 PF: > { %s670_s19 = sand.u32 1, %s967_s12   ;;  %p1270_p0 = scmp.ge.s32.totalorder %s987_s17, 2 }
 0x201   : > { %s671_s21 = scalar_lea.sflag [#allocation4], %s670_s19 }
 0x202   : > { %p789_p1 = pnand %p1270_p0, %p1074_p11 }
 0x204   : > { %p790_p3 = pneg %p789_p1 }
 0x206   : > { %962 = dma.done.wait (%p790_p3), %s671_s21, 1024  }
 0x207   : > { %964 = vsyncadd (%p790_p3), %s671_s21, 4294966272  ;;  %s19_s17 = sadd.s32 1, %s987_s17   ;;  %s1271_s12 = smov %s971_s13 }
 0x208   : > { %p16_p5 = scmp.ge.s32.totalorder %s19_s17, 4   ;;  %s1272_s13 = smov %s975_s14 }
 0x209   : > { %s1273_s14 = smov %s1072_s26  ;;  %s1274_s15 = smov %s983_s16 }
 0x20a   : > { %s1275_s16 = smov %s1277_s20  ;;  %18 = sbr.rel (!%p16_p5) target bundleno = 6 (0x6), region = 78 }
 0x20f   :  { %676 = vsyncpa [#allocation3], 1 }
 0x210   :  { %678 = vsyncpa [#allocation3 + $0x1], 1 }
 0x211   :  { %679 = vsyncpa [#allocation4], 1 }
 0x212   :  { %681 = vsyncpa [#allocation4 + $0x1], 1 }

</bundles_post_ra>
